<compile_context>
chip_gen: v6e
topology: v6e:2x2x1
jax: 0.10.0
libtpu: 0.0.40
codegen_flags: <defaults>
</compile_context>

<pallas_src>
import jax
import jax.numpy as jnp
from jax.experimental import pallas as pl
from jax.experimental.pallas import tpu as pltpu


def mf_score_kernel(u_ref, i_ref, o_ref):
    # u_ref, i_ref: (D, bm) VMEM tiles (batch on lanes).  o_ref: (1, bm).
    prod = u_ref[...] * i_ref[...]                                  # VPU
    # Reduce over the sublane (embedding) axis -> result is already lane-major.
    s = jnp.sum(prod, axis=0, keepdims=True, dtype=jnp.float32)     # (1, bm)
    o_ref[...] = jax.nn.sigmoid(s)                                  # EUP + VPU


def _pick_bm(batch, dim):
    """Pick a lane-aligned (multiple of 128) batch tile."""
    lanes = 128
    b128 = max(lanes, pl.cdiv(batch, lanes) * lanes)
    # Per-step VMEM ~= 2 inputs * 2 double-buffers * (dim * bm * 4 B); stay
    # well under the ~32 MiB scoped-VMEM default (valid on v5e/v6e/v7x).
    vmem_budget = 24 * 1024 * 1024
    bm_vmem = max(lanes, (vmem_budget // (16 * dim)) // lanes * lanes)
    bm = min(2048, b128, bm_vmem)
    # v7x has 2 TensorCores: keep the parallel grid >= 2 steps when possible.
    if b128 // bm < 2 and b128 >= 2 * lanes:
        bm = max(lanes, (b128 // 2) // lanes * lanes)
    return bm


def mf_forward(u_table, i_table, user_idx, item_idx, *, bm=None):
    """sigmoid(sum(uEmbed[user_idx] * iEmbed[item_idx], axis=1)) -> (B,) f32."""
    B = user_idx.shape[0]
    D = u_table.shape[1]
    if bm is None:
        bm = _pick_bm(B, D)
    else:
        bm = max(128, pl.cdiv(bm, 128) * 128)     # keep the output lane-dense

    # Pad the (cheap) index vectors so the batch is a whole number of tiles.
    B_pad = pl.cdiv(B, bm) * bm
    if B_pad != B:
        user_idx = jnp.pad(user_idx, (0, B_pad - B))
        item_idx = jnp.pad(item_idx, (0, B_pad - B))

    # Glue: embedding gather, then flip to (D, B_pad) so the batch sits on
    # lanes (dense loads + a full-width (1, bm) store inside the kernel).
    uembed_t = jnp.take(u_table, user_idx, axis=0).T      # (D, B_pad)
    iembed_t = jnp.take(i_table, item_idx, axis=0).T      # (D, B_pad)

    out = pl.pallas_call(
        mf_score_kernel,
        out_shape=jax.ShapeDtypeStruct((1, B_pad), jnp.float32),
        grid_spec=pltpu.PrefetchScalarGridSpec(
            num_scalar_prefetch=0,
            grid=(B_pad // bm,),
            in_specs=[
                pl.BlockSpec((D, bm), lambda b: (0, b)),
                pl.BlockSpec((D, bm), lambda b: (0, b)),
            ],
            out_specs=pl.BlockSpec((1, bm), lambda b: (0, b)),
        ),
        compiler_params=pltpu.CompilerParams(
            dimension_semantics=("parallel",),
        ),
    )(uembed_t, iembed_t)
    return out.reshape(-1)[:B]                             # .flatten()


if __name__ == "__main__":
    # Deterministic synthetic parameters (mirrors nn.init.normal_(std=0.01)).
    userNum, itemNum, dim = 64, 128, 32
    batch = 200            # exercises tail padding and a 2-step parallel grid

    key = jax.random.PRNGKey(0)
    k_u, k_i, k_uid, k_iid = jax.random.split(key, 4)
    u_table = 0.01 * jax.random.normal(k_u, (userNum, dim), dtype=jnp.float32)
    i_table = 0.01 * jax.random.normal(k_i, (itemNum, dim), dtype=jnp.float32)

    user_idx = jax.random.randint(k_uid, (batch,), 0, userNum, dtype=jnp.int32)
    item_idx = jax.random.randint(k_iid, (batch,), 0, itemNum, dtype=jnp.int32)

    pred = jax.jit(mf_forward)(u_table, i_table, user_idx, item_idx)
    pred = jax.block_until_ready(pred)

    # Pure-JAX reference check.
    ref = jax.nn.sigmoid(
        jnp.sum(u_table[user_idx] * i_table[item_idx], axis=1)
    ).reshape(-1)
    assert pred.shape == (batch,)
    assert jnp.allclose(pred, ref, atol=1e-6, rtol=1e-6)

    print("KERNEL_OK")
</pallas_src>

<mosaic_0001>
module attributes {stable_mosaic.version = 11 : i64} {
  func.func @mf_score_kernel(%arg0: i32, %arg1: memref<32x128xf32, #tpu.memory_space<vmem>>, %arg2: memref<32x128xf32, #tpu.memory_space<vmem>>, %arg3: memref<1x128xf32, #tpu.memory_space<vmem>>) attributes {dimension_semantics = [#tpu.dimension_semantics<parallel>], iteration_bounds = array<i64: 2>, scalar_prefetch = 0 : i64, scratch_operands = 0 : i64, tpu.core_type = #tpu.core_type<tc>, window_params = [{transform_indices = @transform_0, window_bounds = array<i64: 32, 128>}, {transform_indices = @transform_1, window_bounds = array<i64: 32, 128>}, {transform_indices = @transform_2, window_bounds = array<i64: 1, 128>}]} {
    %c0 = arith.constant 0 : index
    %c0_0 = arith.constant 0 : index
    %0 = vector.load %arg1[%c0, %c0_0] : memref<32x128xf32, #tpu.memory_space<vmem>>, vector<32x128xf32>
    %c0_1 = arith.constant 0 : index
    %c0_2 = arith.constant 0 : index
    %1 = vector.load %arg2[%c0_1, %c0_2] : memref<32x128xf32, #tpu.memory_space<vmem>>, vector<32x128xf32>
    %2 = arith.mulf %0, %1 : vector<32x128xf32>
    %cst = arith.constant dense<0.000000e+00> : vector<128xf32>
    %3 = vector.multi_reduction <add>, %2, %cst [0] : vector<32x128xf32> to vector<128xf32>
    %4 = vector.shape_cast %3 : vector<128xf32> to vector<1x128xf32>
    %5 = arith.negf %4 : vector<1x128xf32>
    %6 = math.exp %5 : vector<1x128xf32>
    %cst_3 = arith.constant 1.000000e+00 : f32
    %7 = vector.broadcast %cst_3 : f32 to vector<1x128xf32>
    %8 = arith.addf %7, %6 : vector<1x128xf32>
    %9 = arith.divf %7, %8 : vector<1x128xf32>
    %c0_4 = arith.constant 0 : index
    %c0_5 = arith.constant 0 : index
    %10 = vector.load %arg3[%c0_4, %c0_5] : memref<1x128xf32, #tpu.memory_space<vmem>>, vector<1x128xf32>
    tpu.vector_store %arg3[%c0_4, %c0_5], %9 {strides = array<i32>} : memref<1x128xf32, #tpu.memory_space<vmem>>, vector<1x128xf32>,
    return
  }
  func.func @transform_0(%arg0: i32) -> (i32, i32) {
    %c0_i32 = arith.constant 0 : i32
    %c0_i32_0 = arith.constant 0 : i32
    return %c0_i32, %arg0 : i32, i32
  }
  func.func @transform_1(%arg0: i32) -> (i32, i32) {
    %c0_i32 = arith.constant 0 : i32
    %c0_i32_0 = arith.constant 0 : i32
    return %c0_i32, %arg0 : i32, i32
  }
  func.func @transform_2(%arg0: i32) -> (i32, i32) {
    %c0_i32 = arith.constant 0 : i32
    %c0_i32_0 = arith.constant 0 : i32
    return %c0_i32, %arg0 : i32, i32
  }
}

</mosaic_0001>

<bundles_post_ra>
// kernel: mf_forward.1
= control target key start
LH: loop header
LB: loop body
LE: loop exit
PB: predicated region body
PF: predicated region fallthrough
CT: control target
= control target key end

     0   :  { %7 = vsyncpa [#allocation5], 0  ;;  %s626_s0 = inlined_call_operand.vmem [shape: f32[32,256], index: 0, kind: input, shape index: {}]   ;;  %s627_s1 = inlined_call_operand.vmem [shape: f32[32,256], index: 1, kind: input, shape index: {}]   ;;  %s628_s2 = inlined_call_operand.hbm [shape: f32[1,256], index: 2, kind: output, shape index: {}]  }
   0x1   :  { %9 = vsyncpa [#allocation5 + $0x1], 0  ;;  %s510_s9 = smov 0   ;;  %s512_s10 = smov 0  }
   0x2   :  { %s514_s11 = smov 0   ;;  %s516_s12 = smov 0  }
   0x3 LB: > { %s374_s13 = sadd.s32 4294967295, %s492_s12   ;;  %s375_s14 = sadd.s32 4294967294, %s492_s12   ;;  %s492_s12 = sphi %s516_s12, %s637_s12   ;;  %s488_s11 = sphi %s514_s11, %s636_s11   ;;  %s484_s10 = sphi %s512_s10, %s635_s10   ;;  %s480_s9 = sphi %s510_s9, %s634_s9  }
   0x4   : > { %s533_s15 = sadd.s32 1, %s492_s12   ;;  %s22_s16 = sadd.s32 1, %s488_s11 }
   0x5   : > { %s19_s17 = ssub.s32 %s492_s12, %s533_s15  ;;  %p29_p0 = scmp.ne.s32.totalorder %s488_s11, %s484_s10 }
   0x6   : > { %p20_p1 = scmp.eq.s32.totalorder %s19_s17, 0  ;;  %p30_p2 = scmp.eq.s32.totalorder %s492_s12, 0 }
   0x7   : > { %p85_p3 = scmp.eq.s32.totalorder %s374_s13, 1  ;;  %p90_p4 = scmp.ne.s32.totalorder %s484_s10, %s480_s9 }
   0x8   : > { %s546_s18 = scalar_select %p20_p1, %s488_s11, %s22_s16  }
   0x9   : > { %p548_p5 = por %p30_p2, %p29_p0  ;;  %p552_p6 = por %p85_p3, %p29_p0 }
   0xa   : > { %p91_p7 = scmp.eq.s32.totalorder %s375_s14, 1  ;;  %p629_p9 = scmp.ge.s32.totalorder %s492_s12, 2 }
   0xc   : > { %p556_p8 = por %p91_p7, %p90_p4  ;;  %107 = sbr.rel (%p629_p9) target bundleno = 29 (0x1d), region = 16 }
  0x11   : > { %110 = sbr.rel (!%p548_p5) target bundleno = 23 (0x17), region = 20  ;;  %s112_s22 = sand.u32 (%p548_p5), 1, %s488_s11  }
  0x12   : > { %s379_s23 = sshll.u32 (%p548_p5), %s492_s12, 3  ;;  %s378_s24 = sshll.u32 (%p548_p5), %s112_s22, 5 }
  0x13   : > { %s116_s27 = scalar_lea.vmem (%p548_p5), %s626_s0, %s379_s23  ;;  %s114_s28 = scalar_lea.vmem (%p548_p5), [#allocation2], %s378_s24 }
  0x14   : > { %v151_v0 = vld [vmem:[%s116_s27] sm:$0xff] (%p548_p5)  ;;  %v153_v1 = vld [vmem:[%s116_s27 + $0x10] sm:$0xff] (%p548_p5) }
  0x15   : > { %v155_v2 = vld [vmem:[%s116_s27 + $0x20] sm:$0xff] (%p548_p5)  ;;  %152 = vst [vmem:[%s114_s28] sm:$0xff] (%p548_p5), %v151_v0  ;;  %154 = vst [vmem:[%s114_s28 + $0x8] sm:$0xff] (%p548_p5), %v153_v1  ;;  %v157_v3 = vld [vmem:[%s116_s27 + $0x30] sm:$0xff] (%p548_p5) }
  0x16   : > { %156 = vst [vmem:[%s114_s28 + $0x10] sm:$0xff] %v155_v2  ;;  %158 = vst [vmem:[%s114_s28 + $0x18] sm:$0xff] %v157_v3 }
  0x17 PF: > { %164 = sbr.rel (!%p548_p5) target bundleno = 29 (0x1d), region = 58  ;;  %s166_s29 = sand.u32 (%p548_p5), 1, %s488_s11  }
  0x18   : > { %s381_s30 = sshll.u32 (%p548_p5), %s492_s12, 3  ;;  %s380_s3 = sshll.u32 (%p548_p5), %s166_s29, 5 }
  0x19   : > { %s170_s6 = scalar_lea.vmem (%p548_p5), %s627_s1, %s381_s30  ;;  %s168_s7 = scalar_lea.vmem (%p548_p5), [#allocation3], %s380_s3 }
  0x1a   : > { %v205_v4 = vld [vmem:[%s170_s6] sm:$0xff] (%p548_p5)  ;;  %v207_v5 = vld [vmem:[%s170_s6 + $0x10] sm:$0xff] (%p548_p5) }
  0x1b   : > { %v209_v6 = vld [vmem:[%s170_s6 + $0x20] sm:$0xff] (%p548_p5)  ;;  %206 = vst [vmem:[%s168_s7] sm:$0xff] (%p548_p5), %v205_v4  ;;  %208 = vst [vmem:[%s168_s7 + $0x8] sm:$0xff] (%p548_p5), %v207_v5  ;;  %v211_v7 = vld [vmem:[%s170_s6 + $0x30] sm:$0xff] (%p548_p5) }
  0x1c   : > { %210 = vst [vmem:[%s168_s7 + $0x10] sm:$0xff] %v209_v6  ;;  %212 = vst [vmem:[%s168_s7 + $0x18] sm:$0xff] %v211_v7 }
  0x1d PF: > { %p382_p10 = scmp.ge.s32.totalorder %s492_s12, 1  ;;  %p217_p11 = scmp.lt.s32.totalorder %s492_s12, 3 }
  0x1f   : > { %p218_p12 = pnand %p382_p10, %p217_p11 }
  0x20   : > { %s580_s8 = sand.u32 (!%p218_p12), 1, %s484_s10   ;;  %s386_s23 = sshll.u32 (!%p218_p12), %s374_s13, 4 }
  0x21   : > { %221 = sbr.rel (%p218_p12) target bundleno = 105 (0x69), region = 96  ;;  %s383_s14 = sshll.u32 (!%p218_p12), %s580_s8, 5 }
  0x22   : > { %s226_s16 = scalar_lea.vmem (!%p218_p12), [#allocation2], %s383_s14  ;;  %s233_s17 = scalar_lea.vmem (!%p218_p12), [#allocation3], %s383_s14 }
  0x23   : > { %s254_s19 = scalar_lea.vmem (!%p218_p12), [#allocation4], %s580_s8  ;;  %s294_s26 = scalar_lea.hbm (!%p218_p12), %s628_s2, %s386_s23 }
  0x24   : > { %s296_s22 = sshll.u32 (!%p218_p12), %s254_s19, 4  ;;  %s284_s27 = scalar_lea.sflag (!%p218_p12), [#allocation5], %s580_s8  ;;  %s586_s22 = int_to_ptr.vmem [resolvable:$true] %s296_s22 }
  0x25   : > { %s432_s28 = scalar_lea.vmem (!%p218_p12), %s586_s22, 16  ;;  %s494_s29 = smov (!%p218_p12), [#allocation4]  }
  0x26   : > { %v255_v8 = vld [vmem:[%s226_s16] sm:$0xff]  ;;  %v256_v9 = vld [vmem:[%s226_s16 + $0x8] sm:$0xff]  ;;  %v257_v10 = vld [vmem:[%s226_s16 + $0x10] sm:$0xff]  ;;  %p433_p13 = scmp.ne.s32.totalorder %s586_s22, %s432_s28  ;;  %s436_s30 = sshll.u32 %s494_s29, 4  ;;  %s437_s30 = int_to_ptr.vmem [resolvable:$false] %s436_s30 }
  0x27   : > { %v258_v11 = vld [vmem:[%s226_s16 + $0x18] sm:$0xff]  ;;  %v259_v12 = vld [vmem:[%s233_s17] sm:$0xff]  ;;  %v260_v13 = vld [vmem:[%s233_s17 + $0x8] sm:$0xff]  ;;  %s438_s13 = scalar_lea.vmem %s437_s30, 32  ;;  %p439_p2 = scmp.lt.s32.totalorder %s586_s22, %s437_s30 }
  0x28   : > { %v261_v14 = vld [vmem:[%s233_s17 + $0x10] sm:$0xff]  ;;  %v262_v15 = vld [vmem:[%s233_s17 + $0x18] sm:$0xff]  ;;  %v263_v16 = vmul.f32 %v259_v12, %v255_v8  ;;  %v264_v17 = vmul.f32 %v260_v13, %v256_v9  ;;  %p434_p0 = pnand %p433_p13, %p552_p6  ;;  %p440_p3 = scmp.lt.s32.totalorder %s438_s13, %s432_s28 }
  0x29   : > { %v265_v18 = vmul.f32 %v261_v14, %v257_v10  ;;  %v266_v19 = vmul.f32 %v262_v15, %v258_v11 }
  0x2a   : > { %v267_v20 = vadd.f32 %v264_v17, %v263_v16  ;;  %p435_p1 = pneg %p434_p0  ;;  %p441_p4 = por %p440_p3, %p439_p2 }
  0x2c   : > { %v268_v21 = vadd.f32 %v267_v20, %v265_v18  ;;  %p442_p5 = pnand %p441_p4, %p435_p1 }
  0x2e   : > { %v269_v22 = vadd.f32 %v268_v21, %v266_v19 }
  0x30   : > { %v270_v23 = vrot.slane %v269_v22, 4 }
  0x32   : > { %v271_v24 = vadd.f32 %v270_v23, %v269_v22 }
  0x34   : > { %v272_v25 = vrot.slane %v271_v24, 2 }
  0x36   : > { %v273_v26 = vadd.f32 %v272_v25, %v271_v24 }
  0x38   : > { %v274_v27 = vrot.slane %v273_v26, 1 }
  0x3a   : > { %v275_v28 = vadd.f32 %v274_v27, %v273_v26 }
  0x3c   : > { %v385_v29 = vmul.f32 -1.442695, %v275_v28 }
  0x3e   : > { %428 = vpow2.f32 %v385_v29 }
  0x4b   : > { %v429_v30 = vpop.eup %428 }
  0x4c   : > { %v279_v31 = vadd.f32 1.0, %v429_v30 }
  0x4e   : > { %430 = vrcp.f32 %v279_v31 }
  0x5b   : > { %v431_v32 = vpop.eup %430 }
  0x5c   : > { %282 = vst [vmem:[%s254_s19] sm:$0x1] %v431_v32 }
  0x5d   : > { %445 = shalt.err (!%p442_p5)
}
  0x5e   : > { %s446_s3 = scalar_lea.hbm %s294_s26, 16  ;;  %s450_s6 = scalar_lea.hbm %s628_s2, 32 }
  0x5f   : > { %p447_p7 = scmp.ne.s32.totalorder %s294_s26, %s446_s3  ;;  %p451_p12 = scmp.lt.s32.totalorder %s294_s26, %s628_s2 }
  0x60   : > { %p452_p13 = scmp.lt.s32.totalorder %s450_s6, %s446_s3 }
  0x61   : > { %p448_p10 = pnand %p447_p7, %p552_p6 }
  0x62   : > { %p453_p0 = por %p452_p13, %p451_p12 }
  0x63   : > { %p449_p11 = pneg %p448_p10 }
  0x65   : > { %p454_p9 = pnand %p453_p0, %p449_p11 }
  0x67   : > { %457 = shalt.err (!%p454_p9)
}
  0x68   : > { %389 = dma.vmem_to_hbm [thread:$0]  (%p552_p6), %s586_s22, 16, %s294_s26, %s284_s27  }
  0x69 PF: > { %s308_s14 = sand.u32 1, %s480_s9   ;;  %p633_p1 = scmp.ge.s32.totalorder %s492_s12, 2 }
  0x6a   : > { %s309_s16 = scalar_lea.sflag [#allocation5], %s308_s14 }
  0x6b   : > { %p392_p2 = pnand %p633_p1, %p556_p8 }
  0x6d   : > { %p393_p3 = pneg %p392_p2 }
  0x6f   : > { %475 = dma.done.wait (%p393_p3), %s309_s16, 16  }
  0x70   : > { %477 = vsyncadd (%p393_p3), %s309_s16, 4294967280  ;;  %p12_p9 = scmp.ge.s32.totalorder %s533_s15, 4   ;;  %s634_s9 = smov %s484_s10 }
  0x71   : > { %s635_s10 = smov %s488_s11  ;;  %s636_s11 = smov %s546_s18 }
  0x72   : > { %s637_s12 = smov %s533_s15  ;;  %14 = sbr.rel (!%p12_p9) target bundleno = 3 (0x3), region = 152 }
  0x77   :  { %313 = vsyncpa [#allocation5], 1 }
  0x78   :  { %315 = vsyncpa [#allocation5 + $0x1], 1 }

</bundles_post_ra>
